<compile_context>
chip_gen: v6e
topology: v6e:2x2x1
jax: 0.10.0
libtpu: 0.0.40
codegen_flags: <defaults>
</compile_context>

<pallas_src>
import functools

import jax
import jax.numpy as jnp
from jax.experimental import pallas as pl
from jax.experimental.pallas import tpu as pltpu

ALPHA = 0.25
GAMMA = 2.0  # kernel specializes gamma == 2 (explicit square instead of pow)

_MIB = 1024 * 1024


def _round_up(x, m):
    return ((x + m - 1) // m) * m


def _tpu_vmem_capacity_bytes():
    """Physical VMEM per TensorCore; falls back to the smallest (v7x, 64 MiB)."""
    try:
        return int(pltpu.get_tpu_info().vmem_capacity_bytes)
    except Exception:
        return 64 * _MIB


def _per_row_vmem_bytes(c):
    """Model of VMEM bytes needed per tile row (f32, lane-padded layouts)."""
    lane_c = _round_up(c, 128)
    # 2x logits tile (double-buffered)                      : 2 * lane_c * 4
    # 2x (tile,1) targets tile, lane-padded to 128 lanes    : 2 * 128   * 4
    # live [tile, C] temporaries (x-m, e, col iota, masked x): 4 * lane_c * 4
    # live [tile, 1] per-row temporaries (m, lse, x_t, ce,..): 6 * 128   * 4
    return 4 * (6 * lane_c + 8 * 128)


def _choose_tile_n(n, c, vmem_budget_bytes):
    """Largest multiple-of-8 row tile whose pipelined footprint fits the budget."""
    per_row = _per_row_vmem_bytes(c)
    rows = (vmem_budget_bytes - 4 * _MIB) // per_row   # 4 MiB headroom
    rows = max(8, (rows // 8) * 8)
    rows = min(rows, 32768)               # sanity cap on a single grid step
    rows = min(rows, _round_up(n, 8))     # don't over-allocate for small N
    return max(8, rows)


def _focal_loss_kernel(logits_ref, targets_ref, out_ref, *, n_rows, tile_n,
                       mxu_lane_reduce):
    # logits_ref : [tile_n, C] f32/bf16 (VMEM)  -- last block may be ragged
    # targets_ref: [tile_n, 1] i32      (VMEM)
    # out_ref    : [1, 8, 128] f32      (VMEM)  -- per-block partial sum
    x = logits_ref[...].astype(jnp.float32)                # math in f32
    t = targets_ref[...]                                    # [tn, 1]
    tn, c = x.shape

    # Numerically stable logsumexp along the class (lane) axis.
    m = jnp.max(x, axis=-1, keepdims=True)                  # [tn, 1]
    e = jnp.exp(x - m)                                       # [tn, C]

    # Target logit via a masked select (no convert + mul), then fused CE.
    col = jax.lax.broadcasted_iota(jnp.int32, (tn, c), 1)    # [tn, C]
    xt_terms = jnp.where(col == t, x, 0.0)                   # [tn, C]

    if mxu_lane_reduce:
        # v7x: only 2 XLUs but an idle MXU -> do 2 of the 3 per-row lane
        # reductions as matmuls against a ones column (HIGHEST precision keeps
        # f32 accuracy); the row max stays on the XLU.
        ones = jnp.ones((c, 128), dtype=jnp.float32)
        sum_e = jnp.dot(e, ones, preferred_element_type=jnp.float32,
                        precision=jax.lax.Precision.HIGHEST)[:, :1]
        x_t = jnp.dot(xt_terms, ones, preferred_element_type=jnp.float32,
                      precision=jax.lax.Precision.HIGHEST)[:, :1]
    else:
        sum_e = jnp.sum(e, axis=-1, keepdims=True)           # [tn, 1]
        x_t = jnp.sum(xt_terms, axis=-1, keepdims=True)      # [tn, 1]

    ce = (m + jnp.log(sum_e)) - x_t                           # [tn, 1]

    # Focal term; gamma == 2 -> explicit square (VPU mul, not pow on the EUP).
    pt = jnp.exp(-ce)
    one_m_pt = 1.0 - pt
    focal = ALPHA * (one_m_pt * one_m_pt) * ce                # [tn, 1]

    # Mask ragged tail rows (no host-side padding of the logits / targets).
    row = (jax.lax.broadcasted_iota(jnp.int32, (tn, 1), 0)
           + pl.program_id(0) * tile_n)
    focal = jnp.where(row < n_rows, focal, 0.0)

    partial = jnp.sum(focal)                                  # scalar per block
    out_ref[...] = jnp.broadcast_to(partial, out_ref.shape).astype(out_ref.dtype)


@functools.partial(jax.jit,
                   static_argnames=("tile_n", "mxu_lane_reduce", "vmem_limit"))
def _focal_loss_impl(logits, targets, *, tile_n, mxu_lane_reduce, vmem_limit):
    n, c = logits.shape
    num_blocks = pl.cdiv(n, tile_n)           # ragged last block, no jnp.pad
    targets2d = targets.astype(jnp.int32).reshape(n, 1)

    kernel = functools.partial(_focal_loss_kernel, n_rows=n, tile_n=tile_n,
                               mxu_lane_reduce=mxu_lane_reduce)

    partials = pl.pallas_call(
        kernel,
        out_shape=jax.ShapeDtypeStruct((num_blocks, 8, 128), jnp.float32),
        grid=(num_blocks,),
        in_specs=[
            # Default double-buffering; bump to pipeline_mode=pl.Buffered(3)
            # only if a profile shows exposed DMA after the tile enlargement.
            pl.BlockSpec((tile_n, c), lambda i: (i, 0)),
            pl.BlockSpec((tile_n, 1), lambda i: (i, 0)),
        ],
        out_specs=pl.BlockSpec((1, 8, 128), lambda i: (i, 0, 0)),
        compiler_params=pltpu.CompilerParams(
            dimension_semantics=("parallel",),
            vmem_limit_bytes=vmem_limit,
        ),
    )(logits, targets2d)

    # Tiny final reduction outside the kernel (one lane per block), global N.
    return jnp.sum(partials[:, 0, 0]) / jnp.float32(n)


def focal_loss(logits, targets, *, tile_n=None, mxu_lane_reduce=None):
    """logits: [N, C] float32/bfloat16, targets: [N] int indices -> scalar f32."""
    n, c = logits.shape
    if n == 0:
        return jnp.float32(jnp.nan)   # torch .mean() over an empty batch is NaN

    vmem_cap = _tpu_vmem_capacity_bytes()
    vmem_budget = (3 * vmem_cap) // 4          # ~48 MiB on v7x, ~96 MiB v5e/v6e
    if mxu_lane_reduce is None:
        mxu_lane_reduce = vmem_cap <= 64 * _MIB     # v7x-like -> offload to MXU
    if tile_n is None:
        tile_n = _choose_tile_n(n, c, vmem_budget)
    tile_n = max(8, (int(tile_n) // 8) * 8)

    return _focal_loss_impl(logits, targets, tile_n=tile_n,
                            mxu_lane_reduce=bool(mxu_lane_reduce),
                            vmem_limit=int(vmem_budget))


def _reference_focal_loss(logits, targets):
    # Pure-JAX reference mirroring the PyTorch module (alpha=0.25, gamma=2).
    log_probs = jax.nn.log_softmax(logits, axis=-1)
    ce = -jnp.take_along_axis(log_probs, targets[:, None], axis=-1)[:, 0]
    pt = jnp.exp(-ce)
    return jnp.mean(ALPHA * (1.0 - pt) ** GAMMA * ce)


if __name__ == "__main__":
    key = jax.random.PRNGKey(0)
    k_logits, k_targets = jax.random.split(key)
    N, C = 300, 40  # small shapes; N % tile_n != 0 -> exercises ragged masking
    logits = jax.random.normal(k_logits, (N, C), dtype=jnp.float32)
    targets = jax.random.randint(k_targets, (N,), 0, C, dtype=jnp.int32)

    ref = _reference_focal_loss(logits, targets)

    # Multi-block path with a ragged last block (no padding), VPU reductions.
    loss_tiled = focal_loss(logits, targets, tile_n=128, mxu_lane_reduce=False)
    jax.block_until_ready(loss_tiled)
    assert jnp.allclose(loss_tiled, ref, atol=1e-5, rtol=1e-5), (loss_tiled, ref)

    # Auto path: generation-aware tile size / VMEM budget; on v7x-sized VMEM
    # this also exercises the MXU lane-reduction variant.
    loss_auto = focal_loss(logits, targets)
    jax.block_until_ready(loss_auto)
    assert jnp.allclose(loss_auto, ref, atol=2e-5, rtol=2e-5), (loss_auto, ref)

    print("KERNEL_OK")
</pallas_src>

<mosaic_0001>
module attributes {stable_mosaic.version = 11 : i64} {
  func.func @_focal_loss_kernel(%arg0: i32, %arg1: memref<128x40xf32, #tpu.memory_space<vmem>>, %arg2: memref<128x1xi32, #tpu.memory_space<vmem>>, %arg3: memref<1x8x128xf32, #tpu.memory_space<vmem>>) attributes {dimension_semantics = [#tpu.dimension_semantics<parallel>], iteration_bounds = array<i64: 3>, scalar_prefetch = 0 : i64, scratch_operands = 0 : i64, tpu.core_type = #tpu.core_type<tc>, window_params = [{transform_indices = @transform_0, window_bounds = array<i64: 128, 40>}, {transform_indices = @transform_1, window_bounds = array<i64: 128, 1>}, {transform_indices = @transform_2, window_bounds = array<i64: 1, 8, 128>}]} {
    %c0 = arith.constant 0 : index
    %c0_0 = arith.constant 0 : index
    %0 = vector.load %arg1[%c0, %c0_0] : memref<128x40xf32, #tpu.memory_space<vmem>>, vector<128x40xf32>
    %c0_1 = arith.constant 0 : index
    %c0_2 = arith.constant 0 : index
    %1 = vector.load %arg2[%c0_1, %c0_2] : memref<128x1xi32, #tpu.memory_space<vmem>>, vector<128x1xi32>
    %cst = arith.constant dense<0xFF800000> : vector<128xf32>
    %2 = vector.multi_reduction <maximumf>, %0, %cst [1] : vector<128x40xf32> to vector<128xf32>
    %3 = vector.shape_cast %2 : vector<128xf32> to vector<128x1xf32>
    %4 = vector.broadcast %3 : vector<128x1xf32> to vector<128x40xf32>
    %5 = arith.subf %0, %4 : vector<128x40xf32>
    %6 = math.exp %5 : vector<128x40xf32>
    %7 = tpu.iota {dimensions = array<i32: 1>} : vector<128x40xi32>
    %8 = vector.broadcast %1 : vector<128x1xi32> to vector<128x40xi32>
    %9 = arith.cmpi eq, %7, %8 : vector<128x40xi32>
    %cst_3 = arith.constant 0.000000e+00 : f32
    %10 = vector.broadcast %cst_3 : f32 to vector<128x40xf32>
    %11 = arith.select %9, %0, %10 : vector<128x40xi1>, vector<128x40xf32>
    %cst_4 = arith.constant dense<0.000000e+00> : vector<128xf32>
    %12 = vector.multi_reduction <add>, %6, %cst_4 [1] : vector<128x40xf32> to vector<128xf32>
    %13 = vector.shape_cast %12 : vector<128xf32> to vector<128x1xf32>
    %cst_5 = arith.constant dense<0.000000e+00> : vector<128xf32>
    %14 = vector.multi_reduction <add>, %11, %cst_5 [1] : vector<128x40xf32> to vector<128xf32>
    %15 = vector.shape_cast %14 : vector<128xf32> to vector<128x1xf32>
    %16 = math.log %13 : vector<128x1xf32>
    %17 = arith.addf %3, %16 : vector<128x1xf32>
    %18 = arith.subf %17, %15 : vector<128x1xf32>
    %cst_6 = arith.constant 0.000000e+00 : f32
    %19 = vector.broadcast %cst_6 : f32 to vector<128x1xf32>
    %20 = arith.subf %19, %18 : vector<128x1xf32>
    %21 = math.exp %20 : vector<128x1xf32>
    %cst_7 = arith.constant 1.000000e+00 : f32
    %22 = vector.broadcast %cst_7 : f32 to vector<128x1xf32>
    %23 = arith.subf %22, %21 : vector<128x1xf32>
    %24 = arith.mulf %23, %23 : vector<128x1xf32>
    %cst_8 = arith.constant 2.500000e-01 : f32
    %25 = vector.broadcast %cst_8 : f32 to vector<128x1xf32>
    %26 = arith.mulf %25, %24 : vector<128x1xf32>
    %27 = arith.mulf %26, %18 : vector<128x1xf32>
    %28 = tpu.iota {dimensions = array<i32: 0>} : vector<128x1xi32>
    %c128_i32 = arith.constant 128 : i32
    %29 = arith.muli %arg0, %c128_i32 : i32
    %30 = vector.broadcast %29 : i32 to vector<128x1xi32>
    %31 = arith.addi %28, %30 : vector<128x1xi32>
    %c300_i32 = arith.constant 300 : i32
    %32 = vector.broadcast %c300_i32 : i32 to vector<128x1xi32>
    %33 = arith.cmpi slt, %31, %32 : vector<128x1xi32>
    %cst_9 = arith.constant 0.000000e+00 : f32
    %34 = vector.broadcast %cst_9 : f32 to vector<128x1xf32>
    %35 = arith.select %33, %27, %34 : vector<128x1xi1>, vector<128x1xf32>
    %36 = vector.shape_cast %35 : vector<128x1xf32> to vector<1x128x1xf32>
    %cst_10 = arith.constant dense<0.000000e+00> : vector<1xf32>
    %37 = vector.multi_reduction <add>, %36, %cst_10 [1, 2] : vector<1x128x1xf32> to vector<1xf32>
    %38 = vector.shape_cast %37 : vector<1xf32> to vector<1x1x1xf32>
    %39 = vector.extract %38[0, 0, 0] : f32 from vector<1x1x1xf32>
    %40 = vector.broadcast %39 : f32 to vector<1x8x128xf32>
    %c0_11 = arith.constant 0 : index
    %c0_12 = arith.constant 0 : index
    %c0_13 = arith.constant 0 : index
    %41 = vector.load %arg3[%c0_11, %c0_12, %c0_13] : memref<1x8x128xf32, #tpu.memory_space<vmem>>, vector<1x8x128xf32>
    tpu.vector_store %arg3[%c0_11, %c0_12, %c0_13], %40 {strides = array<i32>} : memref<1x8x128xf32, #tpu.memory_space<vmem>>, vector<1x8x128xf32>,
    return
  }
  func.func @transform_0(%arg0: i32) -> (i32, i32) {
    %c0_i32 = arith.constant 0 : i32
    %c0_i32_0 = arith.constant 0 : i32
    return %arg0, %c0_i32 : i32, i32
  }
  func.func @transform_1(%arg0: i32) -> (i32, i32) {
    %c0_i32 = arith.constant 0 : i32
    %c0_i32_0 = arith.constant 0 : i32
    return %arg0, %c0_i32 : i32, i32
  }
  func.func @transform_2(%arg0: i32) -> (i32, i32, i32) {
    %c0_i32 = arith.constant 0 : i32
    %c0_i32_0 = arith.constant 0 : i32
    %c0_i32_1 = arith.constant 0 : i32
    return %arg0, %c0_i32, %c0_i32_0 : i32, i32, i32
  }
}

</mosaic_0001>

<bundles_post_ra>
// kernel: _focal_loss_impl.1
= control target key start
LH: loop header
LB: loop body
LE: loop exit
PB: predicated region body
PF: predicated region fallthrough
CT: control target
= control target key end

     0   :  { %s1010_s9 = smov 0   ;;  %s1452_s0 = inlined_call_operand.vmem [shape: f32[300,40], index: 0, kind: input, shape index: {}]   ;;  %s1453_s1 = inlined_call_operand.vmem [shape: s32[300,1], index: 1, kind: input, shape index: {}]   ;;  %s1454_s2 = inlined_call_operand.vmem [shape: f32[3,8,128], index: 2, kind: output, shape index: {}]  }
   0x1 LB: > { %s1016_s10 = sadd.s32 4294967295, %s992_s9   ;;  %p868_p0 = scmp.ge.s32.totalorder %s992_s9, 1  ;;  %s992_s9 = sphi %s1010_s9, %s12_s9  }
   0x2   : > { %p140_p1 = scmp.lt.s32.totalorder %s992_s9, 4 }
   0x4   : > { %p141_p2 = pnand %p868_p0, %p140_p1 }
   0x5   : > { %s869_s11 = sshll.u32 (!%p141_p2), %s1016_s10, 4  ;;  %s874_s19 = sshll.u32 (!%p141_p2), %s1016_s10, 7 }
   0x6   : > { %144 = sbr.rel (%p141_p2) target bundleno = 631 (0x277), region = 28  ;;  %p179_p3 = scmp.lt.s32.totalorder (!%p141_p2), %s869_s11, 37 }
   0x7   : > { %p202_p4 = scmp.lt.s32.totalorder (!%p141_p2), %s1016_s10, 2 }
   0xb   : > { %v994_v0 = vmov 0   ;;  %s1456_s11 = smov (!%p179_p3, %s869_s11), 37  ;;  %vm238_vm0 = vcmask 326656   ;;  %s1458_s10 = smov (!%p202_p4, %s1016_s10), 2 }
   0xc   : > { %889 = vset.pattern.permute.xlu1 %v994_v0  ;;  %888 = vset.pattern.permute.xlu0 %v994_v0  ;;  %s870_s12 = sshll.u32 %s1456_s11, 3  ;;  %s873_s20 = sshll.u32 %s1458_s10, 3 }
   0xd   : > { %s1029_s15 = scalar_lea.vmem %s1452_s0, %s870_s12  ;;  %s1116_s18 = scalar_lea.vmem %s1453_s1, %s870_s12 }
   0xe   : > { %v1032_v1 = vld [vmem:[%s1029_s15 + $0x10] sm:$0xff]  ;;  %v1035_v2 = vld [vmem:[%s1029_s15] sm:$0xff]  ;;  %v1038_v3 = vld [vmem:[%s1029_s15 + $0x18] sm:$0xff]  ;;  %s205_s23 = scalar_lea.vmem %s1454_s2, %s873_s20 }
   0xf   : > { %v245_v4 = vsel %vm238_vm0, %v1032_v1, -inf  ;;  %v239_v5 = vsel %vm238_vm0, %v1035_v2, -inf  ;;  %v1045_v6 = vld [vmem:[%s1029_s15 + $0x8] sm:$0xff]  ;;  %v248_v7 = vsel %vm238_vm0, %v1038_v3, -inf  ;;  %v1055_v10 = vld [vmem:[%s1029_s15 + $0x20] sm:$0xff]  ;;  %v1062_v13 = vld [vmem:[%s1029_s15 + $0x38] sm:$0xff] }
  0x10   : > { %246 = vmax.xlane.f32.xlu1 %v245_v4  ;;  %240 = vmax.xlane.f32.xlu0 %v239_v5  ;;  %v242_v8 = vsel %vm238_vm0, %v1045_v6, -inf  ;;  %v1052_v9 = vld [vmem:[%s1029_s15 + $0x28] sm:$0xff]  ;;  %v251_v12 = vsel %vm238_vm0, %v1055_v10, -inf  ;;  %v1065_v14 = vld [vmem:[%s1029_s15 + $0x30] sm:$0xff]  ;;  %v260_v15 = vsel %vm238_vm0, %v1062_v13, -inf  ;;  %v1075_v18 = vld [vmem:[%s1029_s15 + $0x40] sm:$0xff]  ;;  %v335_v5 = vlaneseq }
  0x11   : > { %v254_v11 = vsel %vm238_vm0, %v1052_v9, -inf  ;;  %v257_v16 = vsel %vm238_vm0, %v1065_v14, -inf  ;;  %v1072_v17 = vld [vmem:[%s1029_s15 + $0x48] sm:$0xff]  ;;  %v263_v20 = vsel %vm238_vm0, %v1075_v18, -inf  ;;  %v1082_v21 = vld [vmem:[%s1029_s15 + $0x58] sm:$0xff]  ;;  %v1085_v22 = vld [vmem:[%s1029_s15 + $0x50] sm:$0xff] }
  0x12   : > { %v266_v19 = vsel %vm238_vm0, %v1072_v17, -inf  ;;  %v272_v23 = vsel %vm238_vm0, %v1082_v21, -inf  ;;  %v269_v24 = vsel %vm238_vm0, %v1085_v22, -inf  ;;  %v1092_v25 = vld [vmem:[%s1029_s15 + $0x68] sm:$0xff]  ;;  %v1095_v26 = vld [vmem:[%s1029_s15 + $0x60] sm:$0xff]  ;;  %v1102_v29 = vld [vmem:[%s1029_s15 + $0x78] sm:$0xff] }
  0x13   : > { %v278_v27 = vsel %vm238_vm0, %v1092_v25, -inf  ;;  %v275_v28 = vsel %vm238_vm0, %v1095_v26, -inf  ;;  %v1105_v30 = vld [vmem:[%s1029_s15 + $0x70] sm:$0xff]  ;;  %v284_v31 = vsel %vm238_vm0, %v1102_v29, -inf  ;;  %v223_v33 = vld [vmem:[%s1116_s18 + $0x8] sm:$0xff]  ;;  %v222_v35 = vld [vmem:[%s1116_s18] sm:$0xff] }
  0x14   : > { %249 = vmax.xlane.f32.xlu1 %v248_v7  ;;  %243 = vmax.xlane.f32.xlu0 %v242_v8  ;;  %v281_v32 = vsel %vm238_vm0, %v1105_v30, -inf  ;;  %v224_v34 = vld [vmem:[%s1116_s18 + $0x10] sm:$0xff]  ;;  %v225_v36 = vld [vmem:[%s1116_s18 + $0x18] sm:$0xff]  ;;  %v231_v37 = vld [vmem:[%s1116_s18 + $0x48] sm:$0xff] }
  0x15   : > { %v226_v38 = vld [vmem:[%s1116_s18 + $0x20] sm:$0xff]  ;;  %v233_v39 = vld [vmem:[%s1116_s18 + $0x58] sm:$0xff]  ;;  %v227_v40 = vld [vmem:[%s1116_s18 + $0x28] sm:$0xff] }
  0x16   : > { %v235_v41 = vld [vmem:[%s1116_s18 + $0x68] sm:$0xff]  ;;  %v228_v42 = vld [vmem:[%s1116_s18 + $0x30] sm:$0xff]  ;;  %v237_v43 = vld [vmem:[%s1116_s18 + $0x78] sm:$0xff] }
  0x17   : > { %v229_v44 = vld [vmem:[%s1116_s18 + $0x38] sm:$0xff]  ;;  %v230_v45 = vld [vmem:[%s1116_s18 + $0x40] sm:$0xff]  ;;  %v232_v46 = vld [vmem:[%s1116_s18 + $0x50] sm:$0xff] }
  0x18   : > { %255 = vmax.xlane.f32.xlu1 %v254_v11  ;;  %252 = vmax.xlane.f32.xlu0 %v251_v12  ;;  %v234_v47 = vld [vmem:[%s1116_s18 + $0x60] sm:$0xff]  ;;  %v236_v48 = vld [vmem:[%s1116_s18 + $0x70] sm:$0xff] }
  0x1c   : > { %261 = vmax.xlane.f32.xlu1 %v260_v15  ;;  %258 = vmax.xlane.f32.xlu0 %v257_v16 }
  0x20   : > { %267 = vmax.xlane.f32.xlu1 %v266_v19  ;;  %264 = vmax.xlane.f32.xlu0 %v263_v20  ;;  %v1177_v20 = vand.u32 127, %v335_v5 }
  0x24   : > { %273 = vmax.xlane.f32.xlu1 %v272_v23  ;;  %270 = vmax.xlane.f32.xlu0 %v269_v24 }
  0x28   : > { %279 = vmax.xlane.f32.xlu1 %v278_v27  ;;  %276 = vmax.xlane.f32.xlu0 %v275_v28 }
  0x2c   : > { %285 = vmax.xlane.f32.xlu1 %v284_v31  ;;  %282 = vmax.xlane.f32.xlu0 %v281_v32 }
  0x3d   : > { %341 = vperm.xlu1 %889, %v223_v33  }
  0x41   : > { %344 = vperm.xlu1 %889, %v224_v34  }
  0x42   : > { %338 = vperm.xlu0 %888, %v222_v35  }
  0x45   : > { %347 = vperm.xlu1 %889, %v225_v36  }
  0x46   : > { %365 = vperm.xlu0 %888, %v231_v37  }
  0x49   : > { %350 = vperm.xlu1 %889, %v226_v38  }
  0x4a   : > { %371 = vperm.xlu0 %888, %v233_v39  }
  0x4d   : > { %353 = vperm.xlu1 %889, %v227_v40  }
  0x4e   : > { %377 = vperm.xlu0 %888, %v235_v41  }
  0x51   : > { %356 = vperm.xlu1 %889, %v228_v42  }
  0x52   : > { %383 = vperm.xlu0 %888, %v237_v43  }
  0x55   : > { %359 = vperm.xlu1 %889, %v229_v44  }
  0x59   : > { %362 = vperm.xlu1 %889, %v230_v45  }
  0x5d   : > { %368 = vperm.xlu1 %889, %v232_v46  }
  0x61   : > { %374 = vperm.xlu1 %889, %v234_v47  }
  0x65   : > { %380 = vperm.xlu1 %889, %v236_v48  }
  0x99   : > { %v1134_v49 = vpop.xlane.xlu1 %246  ;;  %v1136_v50 = vpop.xlane.xlu0 %240 }
  0x9a   : > { %v287_v59 = vsub.f32 %v1035_v2, %v1136_v50  ;;  %v289_v7 = vsub.f32 %v1032_v1, %v1134_v49 }
  0x9c   : > { %v303_v62 = vmul.f32 1.442695, %v287_v59  ;;  %v307_v23 = vmul.f32 1.442695, %v289_v7 }
  0x9d   : > { %v1138_v51 = vpop.xlane.xlu1 %249  ;;  %v1140_v52 = vpop.xlane.xlu0 %243 }
  0x9e   : > { %v290_v63 = vsub.f32 %v1038_v3, %v1138_v51  ;;  %v288_v0 = vsub.f32 %v1045_v6, %v1140_v52  ;;  %890 = vpow2.f32 %v303_v62 }
  0xa0   : > { %v309_v8 = vmul.f32 1.442695, %v290_v63  ;;  %v305_v12 = vmul.f32 1.442695, %v288_v0 }
  0xa1   : > { %v1142_v53 = vpop.xlane.xlu1 %255  ;;  %v1144_v54 = vpop.xlane.xlu0 %252 }
  0xa2   : > { %v292_v15 = vsub.f32 %v1052_v9, %v1142_v53  ;;  %v291_v19 = vsub.f32 %v1055_v10, %v1144_v54  ;;  %892 = vpow2.f32 %v309_v8 }
  0xa3   : > { %894 = vpow2.f32 %v305_v12 }
  0xa4   : > { %v313_v27 = vmul.f32 1.442695, %v292_v15  ;;  %v311_v32 = vmul.f32 1.442695, %v291_v19  ;;  %896 = vpow2.f32 %v307_v23 }
  0xa5   : > { %v1146_v55 = vpop.xlane.xlu1 %261  ;;  %v1148_v56 = vpop.xlane.xlu0 %258 }
  0xa6   : > { %v294_v24 = vsub.f32 %v1062_v13, %v1146_v55  ;;  %v293_v33 = vsub.f32 %v1065_v14, %v1148_v56  ;;  %898 = vpow2.f32 %v313_v27 }
  0xa7   : > { %900 = vpow2.f32 %v311_v32 }
  0xa8   : > { %v317_v34 = vmul.f32 1.442695, %v294_v24  ;;  %v315_v40 = vmul.f32 1.442695, %v293_v33 }
  0xa9   : > { %v1150_v57 = vpop.xlane.xlu1 %267  ;;  %v1152_v58 = vpop.xlane.xlu0 %264 }
  0xaa   : > { %v296_v36 = vsub.f32 %v1072_v17, %v1150_v57  ;;  %902 = vpow2.f32 %v317_v34  ;;  %v295_v41 = vsub.f32 %v1075_v18, %v1152_v58 }
  0xab   : > { %v891_v43 = vpop.eup %890  ;;  %904 = vpow2.f32 %v315_v40 }
  0xac   : > { %v321_v44 = vmul.f32 1.442695, %v296_v36  ;;  %v319_v59 = vmul.f32 1.442695, %v295_v41  ;;  %v417_v62 = vsel %vm238_vm0, %v891_v43, 0.0 }
  0xad   : > { %v1156_v60 = vpop.xlane.xlu1 %273  ;;  %v1158_v61 = vpop.xlane.xlu0 %270 }
  0xae   : > { %v298_v45 = vsub.f32 %v1082_v21, %v1156_v60  ;;  %906 = vpow2.f32 %v321_v44 }
  0xaf   : > { %v893_v63 = vpop.eup %892  ;;  %908 = vpow2.f32 %v319_v59 }
  0xb0   : > { %v325_v0 = vmul.f32 1.442695, %v298_v45  ;;  %v895_v12 = vpop.eup %894  ;;  %v426_v23 = vsel %vm238_vm0, %v893_v63, 0.0 }
  0xb1   : > { %v1164_v4 = vpop.xlane.xlu1 %279  ;;  %v1168_v11 = vpop.xlane.xlu0 %276 }
  0xb2   : > { %v299_v7 = vsub.f32 %v1095_v26, %v1168_v11  ;;  %v897_v24 = vpop.eup %896  ;;  %910 = vpow2.f32 %v325_v0 }
  0xb3   : > { %v899_v32 = vpop.eup %898 }
  0xb4   : > { %v327_v27 = vmul.f32 1.442695, %v299_v7  ;;  %v901_v33 = vpop.eup %900 }
  0xb5   : > { %v1172_v16 = vpop.xlane.xlu1 %285  ;;  %v1181_v28 = vpop.xlane.xlu0 %282  ;;  %v429_v41 = vsel %vm238_vm0, %v901_v33, 0.0 }
  0xb7   : > { %v903_v36 = vpop.eup %902 }
  0xb8   : > { %v905_v40 = vpop.eup %904  ;;  %v438_v43 = vsel %vm238_vm0, %v903_v36, 0.0 }
  0xb9   : > { %v342_v31 = vpop.permute.xlu1 %341 }
  0xba   : > { %vm386_vm1 = vcmp.eq.s32.totalorder %v1177_v20, %v342_v31  ;;  %v420_v31 = vsel %vm238_vm0, %v895_v12, 0.0 }
  0xbb   : > { %v402_v35 = vsel %vm386_vm1, %v1045_v6, 0.0  ;;  %v907_v44 = vpop.eup %906 }
  0xbc   : > { %v468_v37 = vsel %vm238_vm0, %v402_v35, 0.0  ;;  %v423_v35 = vsel %vm238_vm0, %v897_v24, 0.0  ;;  %v444_v59 = vsel %vm238_vm0, %v907_v44, 0.0 }
  0xbd   : > { %v345_v38 = vpop.permute.xlu1 %344  ;;  %469 = vadd.xlane.f32.xlu0 %v468_v37  ;;  %v339_v39 = vpop.permute.xlu0 %338 }
  0xbe   : > { %vm387_vm2 = vcmp.eq.s32.totalorder %v1177_v20, %v345_v38  ;;  %vm385_vm3 = vcmp.eq.s32.totalorder %v1177_v20, %v339_v39  ;;  %v301_v38 = vsub.f32 %v1105_v30, %v1181_v28  ;;  %v432_v39 = vsel %vm238_vm0, %v899_v32, 0.0 }
  0xbf   : > { %v403_v6 = vsel %vm387_vm2, %v1032_v1, 0.0  ;;  %v401_v42 = vsel %vm385_vm3, %v1035_v2, 0.0  ;;  %v297_v1 = vsub.f32 %v1085_v22, %v1158_v61  ;;  %vm756_vm2 = vcmask 7168  }
  0xc0   : > { %v471_v46 = vsel %vm238_vm0, %v403_v6, 0.0  ;;  %v465_v47 = vsel %vm238_vm0, %v401_v42, 0.0  ;;  %v302_v6 = vsub.f32 %v1102_v29, %v1172_v16  ;;  %v331_v42 = vmul.f32 1.442695, %v301_v38 }
  0xc1   : > { %v348_v48 = vpop.permute.xlu1 %347  ;;  %472 = vadd.xlane.f32.xlu0 %v471_v46  ;;  %466 = vadd.xlane.f32.xlu1 %v465_v47  ;;  %v323_v19 = vmul.f32 1.442695, %v297_v1  ;;  %v909_v46 = vpop.eup %908 }
  0xc2   : > { %vm388_vm4 = vcmp.eq.s32.totalorder %v1177_v20, %v348_v48  ;;  %v333_v47 = vmul.f32 1.442695, %v302_v6  ;;  %v435_v48 = vsel %vm238_vm0, %v905_v40, 0.0  ;;  %v911_v1 = vpop.eup %910  ;;  %v441_v63 = vsel %vm238_vm0, %v909_v46, 0.0  ;;  %v366_v32 = vpop.permute.xlu0 %365 }
  0xc3   : > { %v404_v2 = vsel %vm388_vm4, %v1038_v3, 0.0  ;;  %v300_v3 = vsub.f32 %v1092_v25, %v1164_v4  ;;  %912 = vpow2.f32 %v323_v19  ;;  %v450_v0 = vsel %vm238_vm0, %v911_v1, 0.0 }
  0xc4   : > { %v474_v8 = vsel %vm238_vm0, %v404_v2, 0.0  ;;  %914 = vpow2.f32 %v327_v27  ;;  %vm394_vm10 = vcmp.eq.s32.totalorder %v1177_v20, %v366_v32 }
  0xc5   : > { %v351_v15 = vpop.permute.xlu1 %350  ;;  %475 = vadd.xlane.f32.xlu0 %v474_v8  ;;  %418 = vadd.xlane.f32.xlu1 %v417_v62  ;;  %v329_v37 = vmul.f32 1.442695, %v300_v3  ;;  %v410_v44 = vsel %vm394_vm10, %v1072_v17, 0.0 }
  0xc6   : > { %vm389_vm5 = vcmp.eq.s32.totalorder %v1177_v20, %v351_v15 }
  0xc7   : > { %916 = vpow2.f32 %v329_v37  ;;  %v405_v24 = vsel %vm389_vm5, %v1055_v10, 0.0  ;;  %v372_v37 = vpop.permute.xlu0 %371 }
  0xc8   : > { %918 = vpow2.f32 %v331_v42  ;;  %v477_v3 = vsel %vm238_vm0, %v405_v24, 0.0  ;;  %vm396_vm12 = vcmp.eq.s32.totalorder %v1177_v20, %v372_v37 }
  0xc9   : > { %421 = vadd.xlane.f32.xlu0 %v420_v31  ;;  %427 = vadd.xlane.f32.xlu1 %v426_v23  ;;  %v354_v34 = vpop.permute.xlu1 %353  ;;  %920 = vpow2.f32 %v333_v47  ;;  %v412_v47 = vsel %vm396_vm12, %v1082_v21, 0.0 }
  0xca   : > { %vm390_vm6 = vcmp.eq.s32.totalorder %v1177_v20, %v354_v34 }
  0xcb   : > { %v406_v15 = vsel %vm390_vm6, %v1052_v9, 0.0  ;;  %v378_v42 = vpop.permute.xlu0 %377 }
  0xcc   : > { %vm398_vm14 = vcmp.eq.s32.totalorder %v1177_v20, %v378_v42 }
  0xcd   : > { %424 = vadd.xlane.f32.xlu0 %v423_v35  ;;  %433 = vadd.xlane.f32.xlu1 %v432_v39  ;;  %v357_v45 = vpop.permute.xlu1 %356  ;;  %v480_v35 = vsel %vm238_vm0, %v406_v15, 0.0  ;;  %v414_v1 = vsel %vm398_vm14, %v1092_v25, 0.0 }
  0xce   : > { %vm391_vm7 = vcmp.eq.s32.totalorder %v1177_v20, %v357_v45  ;;  %v492_v45 = vsel %vm238_vm0, %v410_v44, 0.0  ;;  %v504_v21 = vsel %vm238_vm0, %v414_v1, 0.0 }
  0xcf   : > { %v407_v34 = vsel %vm391_vm7, %v1065_v14, 0.0  ;;  %v384_v17 = vpop.permute.xlu0 %383 }
  0xd0   : > { %v913_v62 = vpop.eup %912  ;;  %v483_v38 = vsel %vm238_vm0, %v407_v34, 0.0  ;;  %vm400_vm1 = vcmp.eq.s32.totalorder %v1177_v20, %v384_v17 }
  0xd1   : > { %430 = vadd.xlane.f32.xlu0 %v429_v41  ;;  %439 = vadd.xlane.f32.xlu1 %v438_v43  ;;  %v360_v2 = vpop.permute.xlu1 %359  ;;  %v915_v7 = vpop.eup %914  ;;  %v447_v8 = vsel %vm238_vm0, %v913_v62, 0.0 }
  0xd2   : > { %v453_v12 = vsel %vm238_vm0, %v915_v7, 0.0  ;;  %vm392_vm8 = vcmp.eq.s32.totalorder %v1177_v20, %v360_v2  ;;  %v416_v2 = vsel %vm400_vm1, %v1102_v29, 0.0 }
  0xd3   : > { %v408_v41 = vsel %vm392_vm8, %v1062_v13, 0.0  ;;  %v510_v62 = vsel %vm238_vm0, %v416_v2, 0.0 }
  0xd4   : > { %v917_v19 = vpop.eup %916  ;;  %v486_v6 = vsel %vm238_vm0, %v408_v41, 0.0 }
  0xd5   : > { %436 = vadd.xlane.f32.xlu0 %v435_v48  ;;  %445 = vadd.xlane.f32.xlu1 %v444_v59  ;;  %v363_v23 = vpop.permute.xlu1 %362  ;;  %v456_v27 = vsel %vm238_vm0, %v917_v19, 0.0  ;;  %v919_v31 = vpop.eup %918  ;;  %v498_v48 = vsel %vm238_vm0, %v412_v47, 0.0 }
  0xd6   : > { %v459_v36 = vsel %vm238_vm0, %v919_v31, 0.0  ;;  %v921_v10 = vpop.eup %920  ;;  %vm393_vm9 = vcmp.eq.s32.totalorder %v1177_v20, %v363_v23 }
  0xd7   : > { %v462_v9 = vsel %vm238_vm0, %v921_v10, 0.0  ;;  %v409_v40 = vsel %vm393_vm9, %v1075_v18, 0.0 }
  0xd8   : > { %v489_v14 = vsel %vm238_vm0, %v409_v40, 0.0 }
  0xd9   : > { %442 = vadd.xlane.f32.xlu0 %v441_v63  ;;  %451 = vadd.xlane.f32.xlu1 %v450_v0  ;;  %v369_v33 = vpop.permute.xlu1 %368 }
  0xda   : > { %vm395_vm11 = vcmp.eq.s32.totalorder %v1177_v20, %v369_v33 }
  0xdb   : > { %v411_v43 = vsel %vm395_vm11, %v1085_v22, 0.0 }
  0xdc   : > { %v495_v18 = vsel %vm238_vm0, %v411_v43, 0.0 }
  0xdd   : > { %448 = vadd.xlane.f32.xlu0 %v447_v8  ;;  %454 = vadd.xlane.f32.xlu1 %v453_v12  ;;  %v375_v39 = vpop.permute.xlu1 %374 }
  0xde   : > { %vm397_vm13 = vcmp.eq.s32.totalorder %v1177_v20, %v375_v39 }
  0xdf   : > { %v413_v46 = vsel %vm397_vm13, %v1095_v26, 0.0 }
  0xe0   : > { %v501_v22 = vsel %vm238_vm0, %v413_v46, 0.0 }
  0xe1   : > { %478 = vadd.xlane.f32.xlu0 %v477_v3  ;;  %457 = vadd.xlane.f32.xlu1 %v456_v27  ;;  %v381_v13 = vpop.permute.xlu1 %380 }
  0xe2   : > { %vm399_vm15 = vcmp.eq.s32.totalorder %v1177_v20, %v381_v13 }
  0xe3   : > { %v415_v59 = vsel %vm399_vm15, %v1105_v30, 0.0 }
  0xe4   : > { %v507_v26 = vsel %vm238_vm0, %v415_v59, 0.0 }
  0xe5   : > { %481 = vadd.xlane.f32.xlu0 %v480_v35  ;;  %460 = vadd.xlane.f32.xlu1 %v459_v36 }
  0xe9   : > { %484 = vadd.xlane.f32.xlu0 %v483_v38  ;;  %463 = vadd.xlane.f32.xlu1 %v462_v9 }
  0xed   : > { %490 = vadd.xlane.f32.xlu0 %v489_v14  ;;  %487 = vadd.xlane.f32.xlu1 %v486_v6 }
  0xf1   : > { %496 = vadd.xlane.f32.xlu0 %v495_v18  ;;  %493 = vadd.xlane.f32.xlu1 %v492_v45  ;;  %v1280_v45 = vshrl.u32 %v335_v5, 7 }
  0xf3   : > { %v692_v5 = vadd.s32 16, %v1280_v45 }
  0xf5   : > { %502 = vadd.xlane.f32.xlu0 %v501_v22  ;;  %499 = vadd.xlane.f32.xlu1 %v498_v48 }
  0xf9   : > { %508 = vadd.xlane.f32.xlu0 %v507_v26  ;;  %505 = vadd.xlane.f32.xlu1 %v504_v21  ;;  %v1284_v26 = vstv %s874_s19  ;;  %v691_v21 = vadd.s32 8, %v1280_v45 }
  0xfd   : > { %511 = vadd.xlane.f32.xlu1 %v510_v62 }
 0x146   : > { %v470_v63 = vpop.xlane.xlu0 %469 }
 0x14a   : > { %v467_v0 = vpop.xlane.xlu1 %466  ;;  %v473_v7 = vpop.xlane.xlu0 %472 }
 0x14e   : > { %v419_v8 = vpop.xlane.xlu1 %418  ;;  %v476_v30 = vpop.xlane.xlu0 %475 }
 0x14f   : > { %922 = vlog2.f32 %v419_v8 }
 0x152   : > { %v428_v25 = vpop.xlane.xlu1 %427  ;;  %v422_v12 = vpop.xlane.xlu0 %421 }
 0x153   : > { %924 = vlog2.f32 %v428_v25 }
 0x154   : > { %926 = vlog2.f32 %v422_v12 }
 0x156   : > { %v434_v20 = vpop.xlane.xlu1 %433  ;;  %v425_v19 = vpop.xlane.xlu0 %424 }
 0x157   : > { %928 = vlog2.f32 %v425_v19 }
 0x158   : > { %930 = vlog2.f32 %v434_v20 }
 0x15a   : > { %v440_v23 = vpop.xlane.xlu1 %439  ;;  %v431_v24 = vpop.xlane.xlu0 %430 }
 0x15b   : > { %932 = vlog2.f32 %v431_v24 }
 0x15c   : > { %v923_v29 = vpop.eup %922 }
 0x15d   : > { %v514_v3 = vmul.f32 0.6931472, %v923_v29  ;;  %v695_v29 = vadd.s32 40, %v1280_v45 }
 0x15e   : > { %v446_v27 = vpop.xlane.xlu1 %445  ;;  %v437_v31 = vpop.xlane.xlu0 %436 }
 0x15f   : > { %v545_v32 = vadd.f32 %v514_v3, %v1136_v50  ;;  %934 = vlog2.f32 %v437_v31 }
 0x160   : > { %v925_v15 = vpop.eup %924  ;;  %936 = vlog2.f32 %v440_v23 }
 0x161   : > { %v927_v33 = vpop.eup %926  ;;  %v1266_v35 = vsub.f32 %v545_v32, %v467_v0  ;;  %v520_v36 = vmul.f32 0.6931472, %v925_v15  ;;  %938 = vlog2.f32 %v446_v27  ;;  %v694_v0 = vadd.s32 32, %v1280_v45 }
 0x162   : > { %v516_v10 = vmul.f32 0.6931472, %v927_v33  ;;  %v452_v34 = vpop.xlane.xlu1 %451  ;;  %v443_v37 = vpop.xlane.xlu0 %442  ;;  %v1306_v27 = vadd.s32 %v1284_v26, %v692_v5 }
 0x163   : > { %v577_v38 = vsub.f32 0.0, %v1266_v35  ;;  %v548_v9 = vadd.f32 %v520_v36, %v1138_v51  ;;  %940 = vlog2.f32 %v452_v34  ;;  %v1313_v36 = vadd.s32 %v1284_v26, %v694_v0 }
 0x164   : > { %v546_v39 = vadd.f32 %v516_v10, %v1140_v52  ;;  %942 = vlog2.f32 %v443_v37  ;;  %v929_v50 = vpop.eup %928  ;;  %vm726_vm5 = vcmp.lt.s32.totalorder %v1306_v27, 300 }
 0x165   : > { %v593_v40 = vmul.f32 1.442695, %v577_v38  ;;  %v1271_v41 = vsub.f32 %v548_v9, %v476_v30  ;;  %v931_v14 = vpop.eup %930  ;;  %v518_v42 = vmul.f32 0.6931472, %v929_v50  ;;  %v1295_v30 = vadd.s32 %v1284_v26, %v1280_v45 }
 0x166   : > { %v1273_v6 = vsub.f32 %v546_v39, %v470_v63  ;;  %v455_v43 = vpop.xlane.xlu1 %454  ;;  %v449_v44 = vpop.xlane.xlu0 %448  ;;  %v524_v47 = vmul.f32 0.6931472, %v931_v14  ;;  %v696_v39 = vadd.s32 48, %v1280_v45  ;;  %v1321_v14 = vadd.s32 %v1284_v26, %v695_v29 }
 0x167   : > { %944 = vpow2.f32 %v593_v40  ;;  %v580_v13 = vsub.f32 0.0, %v1271_v41  ;;  %v547_v18 = vadd.f32 %v518_v42, %v1134_v49  ;;  %v693_v49 = vadd.s32 24, %v1280_v45 }
 0x168   : > { %v578_v51 = vsub.f32 0.0, %v1273_v6  ;;  %946 = vlog2.f32 %v455_v43  ;;  %v933_v52 = vpop.eup %932  ;;  %vm724_vm0 = vcmp.lt.s32.totalorder %v1295_v30, 300  ;;  %v697_v40 = vadd.s32 56, %v1280_v45 }
 0x169   : > { %v599_v46 = vmul.f32 1.442695, %v580_v13  ;;  %948 = vlog2.f32 %v449_v44  ;;  %v1282_v22 = vsub.f32 %v547_v18, %v473_v7  ;;  %v522_v48 = vmul.f32 0.6931472, %v933_v52 }
 0x16a   : > { %v595_v17 = vmul.f32 1.442695, %v578_v51  ;;  %v458_v59 = vpop.xlane.xlu1 %457  ;;  %v479_v1 = vpop.xlane.xlu0 %478  ;;  %v550_v7 = vadd.f32 %v524_v47, %v1142_v53  ;;  %v1309_v31 = vadd.s32 %v1284_v26, %v693_v49  ;;  %v698_v51 = vadd.s32 64, %v1280_v45 }
 0x16b   : > { %950 = vpow2.f32 %v599_v46  ;;  %v579_v2 = vsub.f32 0.0, %v1282_v22  ;;  %v549_v62 = vadd.f32 %v522_v48, %v1144_v54  ;;  %v1300_v54 = vadd.s32 %v1284_v26, %v691_v21 }
 0x16c   : > { %952 = vpow2.f32 %v595_v17  ;;  %v935_v63 = vpop.eup %934  ;;  %vm727_vm3 = vcmp.lt.s32.totalorder %v1309_v31, 300  ;;  %vm728_vm6 = vcmp.lt.s32.totalorder %v1313_v36, 300  ;;  %vm729_vm7 = vcmp.lt.s32.totalorder %v1321_v14, 300 }
 0x16d   : > { %954 = vlog2.f32 %v458_v59  ;;  %v937_v8 = vpop.eup %936  ;;  %v597_v25 = vmul.f32 1.442695, %v579_v2  ;;  %v526_v12 = vmul.f32 0.6931472, %v935_v63  ;;  %v1297_v20 = vsub.f32 %v549_v62, %v479_v1 }
 0x16e   : > { %v461_v19 = vpop.xlane.xlu1 %460  ;;  %v482_v23 = vpop.xlane.xlu0 %481  ;;  %v528_v33 = vmul.f32 0.6931472, %v937_v8  ;;  %v1330_v59 = vadd.s32 %v1284_v26, %v696_v39  ;;  %v1333_v1 = vadd.s32 %v1284_v26, %v697_v40  ;;  %vm725_vm4 = vcmp.lt.s32.totalorder %v1300_v54, 300 }
 0x16f   : > { %v939_v24 = vpop.eup %938  ;;  %956 = vlog2.f32 %v461_v19  ;;  %v1303_v3 = vsub.f32 %v550_v7, %v482_v23  ;;  %v581_v32 = vsub.f32 0.0, %v1297_v20  ;;  %v551_v34 = vadd.f32 %v526_v12, %v1148_v56 }
 0x170   : > { %v941_v53 = vpop.eup %940  ;;  %958 = vpow2.f32 %v597_v25  ;;  %v532_v56 = vmul.f32 0.6931472, %v939_v24  ;;  %v552_v47 = vadd.f32 %v528_v33, %v1146_v55  ;;  %v1340_v7 = vadd.s32 %v1284_v26, %v698_v51 }
 0x171   : > { %v943_v15 = vpop.eup %942  ;;  %v582_v10 = vsub.f32 0.0, %v1303_v3  ;;  %v601_v38 = vmul.f32 1.442695, %v581_v32  ;;  %v536_v13 = vmul.f32 0.6931472, %v941_v53  ;;  %vm730_vm8 = vcmp.lt.s32.totalorder %v1330_v59, 300 }
 0x172   : > { %v530_v37 = vmul.f32 0.6931472, %v943_v15  ;;  %v464_v9 = vpop.xlane.xlu1 %463  ;;  %v485_v50 = vpop.xlane.xlu0 %484  ;;  %v554_v25 = vadd.f32 %v532_v56, %v1150_v57  ;;  %vm731_vm9 = vcmp.lt.s32.totalorder %v1333_v1, 300  ;;  %v700_v14 = vadd.s32 80, %v1280_v45 }
 0x173   : > { %v603_v42 = vmul.f32 1.442695, %v582_v10  ;;  %960 = vlog2.f32 %v464_v9  ;;  %v1323_v43 = vsub.f32 %v551_v34, %v485_v50  ;;  %v556_v12 = vadd.f32 %v536_v13, %v1156_v60 }
 0x174   : > { %v945_v44 = vpop.eup %944  ;;  %962 = vpow2.f32 %v601_v38  ;;  %v553_v49 = vadd.f32 %v530_v37, %v1152_v58  ;;  %vm732_vm10 = vcmp.lt.s32.totalorder %v1340_v7, 300 }
 0x175   : > { %v947_v18 = vpop.eup %946  ;;  %v625_v52 = vsub.f32 1.0, %v945_v44  ;;  %964 = vpow2.f32 %v603_v42  ;;  %v583_v46 = vsub.f32 0.0, %v1323_v43 }
 0x176   : > { %v949_v17 = vpop.eup %948  ;;  %v538_v48 = vmul.f32 0.6931472, %v947_v18  ;;  %v488_v21 = vpop.xlane.xlu1 %487 }
 0x177   : > { %v491_v5 = vpop.xlane.xlu0 %490  ;;  %v641_v2 = vmul.f32 %v625_v52, %v625_v52  ;;  %v534_v62 = vmul.f32 0.6931472, %v949_v17  ;;  %v605_v63 = vmul.f32 1.442695, %v583_v46  ;;  %v1337_v55 = vsub.f32 %v552_v47, %v488_v21 }
 0x178   : > { %v951_v0 = vpop.eup %950  ;;  %v1342_v8 = vsub.f32 %v553_v49, %v491_v5  ;;  %v557_v34 = vadd.f32 %v538_v48, %v1168_v11 }
 0x179   : > { %v953_v19 = vpop.eup %952  ;;  %v657_v58 = vmul.f32 0.25, %v641_v2  ;;  %v628_v23 = vsub.f32 1.0, %v951_v0  ;;  %966 = vpow2.f32 %v605_v63  ;;  %v584_v24 = vsub.f32 0.0, %v1337_v55 }
 0x17a   : > { %v955_v29 = vpop.eup %954  ;;  %v626_v53 = vsub.f32 1.0, %v953_v19  ;;  %v585_v32 = vsub.f32 0.0, %v1342_v8  ;;  %v494_v15 = vpop.xlane.xlu1 %493  ;;  %v555_v33 = vadd.f32 %v534_v62, %v1158_v61 }
 0x17b   : > { %v497_v10 = vpop.xlane.xlu0 %496  ;;  %v673_v57 = vmul.f32 %v657_v58, %v1266_v35  ;;  %v644_v37 = vmul.f32 %v628_v23, %v628_v23  ;;  %v540_v60 = vmul.f32 0.6931472, %v955_v29  ;;  %v607_v38 = vmul.f32 1.442695, %v584_v24 }
 0x17c   : > { %v957_v9 = vpop.eup %956  ;;  %v642_v39 = vmul.f32 %v626_v53, %v626_v53  ;;  %v609_v50 = vmul.f32 1.442695, %v585_v32  ;;  %v1352_v40 = vsub.f32 %v554_v25, %v494_v15  ;;  %v1354_v42 = vsub.f32 %v555_v33, %v497_v10 }
 0x17d   : > { %v959_v44 = vpop.eup %958  ;;  %v740_v61 = vsel %vm724_vm0, %v673_v57, 0.0  ;;  %v660_v56 = vmul.f32 0.25, %v644_v37  ;;  %v542_v11 = vmul.f32 0.6931472, %v957_v9  ;;  %968 = vpow2.f32 %v607_v38 }
 0x17e   : > { %v757_v35 = vsel %vm756_vm2, %v740_v61, 0.0  ;;  %v658_v13 = vmul.f32 0.25, %v642_v39  ;;  %v627_v51 = vsub.f32 1.0, %v959_v44  ;;  %970 = vpow2.f32 %v609_v50  ;;  %v500_v18 = vpop.xlane.xlu1 %499 }
 0x17f   : > { %v503_v52 = vpop.xlane.xlu0 %502  ;;  %v676_v46 = vmul.f32 %v660_v56, %v1271_v41  ;;  %v586_v47 = vsub.f32 0.0, %v1352_v40  ;;  %v587_v17 = vsub.f32 0.0, %v1354_v42  ;;  %v1363_v30 = vsub.f32 %v556_v12, %v500_v18 }
 0x180   : > { %v961_v48 = vpop.eup %960  ;;  %v674_v21 = vmul.f32 %v658_v13, %v1273_v6  ;;  %v643_v49 = vmul.f32 %v627_v51, %v627_v51  ;;  %v1367_v5 = vsub.f32 %v557_v34, %v503_v52  ;;  %v558_v2 = vadd.f32 %v540_v60, %v1164_v4 }
 0x181   : > { %v963_v62 = vpop.eup %962  ;;  %v743_v41 = vsel %vm727_vm3, %v676_v46, 0.0  ;;  %v544_v63 = vmul.f32 0.6931472, %v961_v48  ;;  %v611_v0 = vmul.f32 1.442695, %v586_v47  ;;  %v588_v25 = vsub.f32 0.0, %v1363_v30 }
 0x182   : > { %v965_v12 = vpop.eup %964  ;;  %v741_v19 = vsel %vm725_vm4, %v674_v21, 0.0  ;;  %v659_v6 = vmul.f32 0.25, %v643_v49  ;;  %v762_v58 = vsel %vm756_vm2, %v743_v41, 0.0  ;;  %v629_v23 = vsub.f32 1.0, %v963_v62  ;;  %v506_v24 = vpop.xlane.xlu1 %505 }
 0x183   : > { %v758_v29 = vsel %vm756_vm2, %v741_v19, 0.0  ;;  %v630_v4 = vsub.f32 1.0, %v965_v12  ;;  %972 = vpow2.f32 %v611_v0  ;;  %v613_v53 = vmul.f32 1.442695, %v587_v17  ;;  %v509_v57 = vpop.xlane.xlu0 %508 }
 0x184   : > { %v675_v31 = vmul.f32 %v659_v6, %v1282_v22  ;;  %v759_v32 = vadd.f32 %v758_v29, %v757_v35  ;;  %v645_v15 = vmul.f32 %v629_v23, %v629_v23  ;;  %v615_v33 = vmul.f32 1.442695, %v588_v25 }
 0x185   : > { %v646_v10 = vmul.f32 %v630_v4, %v630_v4  ;;  %974 = vpow2.f32 %v613_v53  ;;  %v589_v54 = vsub.f32 0.0, %v1367_v5  ;;  %v1380_v34 = vsub.f32 %v558_v2, %v506_v24 }
 0x186   : > { %v967_v37 = vpop.eup %966  ;;  %v742_v60 = vsel %vm726_vm5, %v675_v31, 0.0  ;;  %v661_v38 = vmul.f32 0.25, %v645_v15  ;;  %976 = vpow2.f32 %v615_v33  ;;  %v559_v22 = vadd.f32 %v542_v11, %v1181_v28  ;;  %v512_v17 = vpop.xlane.xlu1 %511 }
 0x187   : > { %v760_v9 = vsel %vm756_vm2, %v742_v60, 0.0  ;;  %v662_v39 = vmul.f32 0.25, %v646_v10  ;;  %v631_v50 = vsub.f32 1.0, %v967_v37  ;;  %v617_v44 = vmul.f32 1.442695, %v589_v54 }
 0x188   : > { %v761_v61 = vadd.f32 %v760_v9, %v759_v32  ;;  %v677_v56 = vmul.f32 %v661_v38, %v1297_v20  ;;  %v590_v35 = vsub.f32 0.0, %v1380_v34  ;;  %v1388_v13 = vsub.f32 %v559_v22, %v509_v57 }
 0x189   : > { %v678_v51 = vmul.f32 %v662_v39, %v1303_v3  ;;  %v647_v27 = vmul.f32 %v631_v50, %v631_v50  ;;  %978 = vpow2.f32 %v617_v44  ;;  %v560_v18 = vadd.f32 %v544_v63, %v1172_v16 }
 0x18a   : > { %v969_v52 = vpop.eup %968  ;;  %v763_v28 = vadd.f32 %v762_v58, %v761_v61  ;;  %v744_v11 = vsel %vm728_vm6, %v677_v56, 0.0  ;;  %v619_v46 = vmul.f32 1.442695, %v590_v35  ;;  %v591_v47 = vsub.f32 0.0, %v1388_v13 }
 0x18b   : > { %v971_v20 = vpop.eup %970  ;;  %v764_v48 = vsel %vm756_vm2, %v744_v11, 0.0  ;;  %v745_v21 = vsel %vm729_vm7, %v678_v51, 0.0  ;;  %v663_v3 = vmul.f32 0.25, %v647_v27  ;;  %v632_v49 = vsub.f32 1.0, %v969_v52 }
 0x18c   : > { %v765_v2 = vadd.f32 %v764_v48, %v763_v28  ;;  %v766_v16 = vsel %vm756_vm2, %v745_v21, 0.0  ;;  %v633_v62 = vsub.f32 1.0, %v971_v20  ;;  %980 = vpow2.f32 %v619_v46 }
 0x18d   : > { %v679_v36 = vmul.f32 %v663_v3, %v1323_v43  ;;  %v648_v41 = vmul.f32 %v632_v49, %v632_v49  ;;  %v621_v63 = vmul.f32 1.442695, %v591_v47  ;;  %v1400_v0 = vsub.f32 %v560_v18, %v512_v17 }
 0x18e   : > { %v649_v25 = vmul.f32 %v633_v62, %v633_v62  ;;  %v699_v12 = vadd.s32 72, %v1280_v45  ;;  %v767_v43 = vadd.f32 %v766_v16, %v765_v2  ;;  %v701_v31 = vadd.s32 88, %v1280_v45 }
 0x18f   : > { %v746_v19 = vsel %vm730_vm8, %v679_v36, 0.0  ;;  %v664_v6 = vmul.f32 0.25, %v648_v41  ;;  %982 = vpow2.f32 %v621_v63  ;;  %v592_v58 = vsub.f32 0.0, %v1400_v0 }
 0x190   : > { %v973_v23 = vpop.eup %972  ;;  %v768_v24 = vsel %vm756_vm2, %v746_v19, 0.0  ;;  %v665_v29 = vmul.f32 0.25, %v649_v25  ;;  %v717_v10 = vadd.s32 %v1284_v26, %v699_v12  ;;  %v718_v54 = vadd.s32 %v1284_v26, %v700_v14 }
 0x191   : > { %v680_v4 = vmul.f32 %v664_v6, %v1337_v55  ;;  %v634_v53 = vsub.f32 1.0, %v973_v23  ;;  %v623_v32 = vmul.f32 1.442695, %v592_v58  ;;  %v769_v59 = vadd.f32 %v768_v24, %v767_v43 }
 0x192   : > { %v975_v15 = vpop.eup %974  ;;  %v681_v33 = vmul.f32 %v665_v29, %v1342_v8  ;;  %v702_v39 = vadd.s32 96, %v1280_v45  ;;  %v719_v61 = vadd.s32 %v1284_v26, %v701_v31  ;;  %vm733_vm11 = vcmp.lt.s32.totalorder %v717_v10, 300 }
 0x193   : > { %v977_v57 = vpop.eup %976  ;;  %v747_v37 = vsel %vm731_vm9, %v680_v4, 0.0  ;;  %v650_v60 = vmul.f32 %v634_v53, %v634_v53  ;;  %v635_v38 = vsub.f32 1.0, %v975_v15  ;;  %984 = vpow2.f32 %v623_v32 }
 0x194   : > { %v770_v55 = vsel %vm756_vm2, %v747_v37, 0.0  ;;  %v748_v22 = vsel %vm732_vm10, %v681_v33, 0.0  ;;  %v636_v9 = vsub.f32 1.0, %v977_v57  ;;  %v703_v51 = vadd.s32 104, %v1280_v45 }
 0x195   : > { %v771_v8 = vadd.f32 %v770_v55, %v769_v59  ;;  %v666_v50 = vmul.f32 0.25, %v650_v60  ;;  %v651_v44 = vmul.f32 %v635_v38, %v635_v38  ;;  %v772_v1 = vsel %vm756_vm2, %v748_v22, 0.0 }
 0x196   : > { %v979_v56 = vpop.eup %978  ;;  %v652_v35 = vmul.f32 %v636_v9, %v636_v9  ;;  %vm734_vm12 = vcmp.lt.s32.totalorder %v718_v54, 300  ;;  %v720_v11 = vadd.s32 %v1284_v26, %v702_v39  ;;  %vm735_vm13 = vcmp.lt.s32.totalorder %v719_v61, 300 }
 0x197   : > { %v773_v27 = vadd.f32 %v772_v1, %v771_v8  ;;  %v682_v18 = vmul.f32 %v666_v50, %v1352_v40  ;;  %v667_v7 = vmul.f32 0.25, %v651_v44  ;;  %v637_v52 = vsub.f32 1.0, %v979_v56 }
 0x198   : > { %v668_v28 = vmul.f32 0.25, %v652_v35  ;;  %v704_v49 = vadd.s32 112, %v1280_v45  ;;  %v721_v62 = vadd.s32 %v1284_v26, %v703_v51  ;;  %vm736_vm14 = vcmp.lt.s32.totalorder %v720_v11, 300 }
 0x199   : > { %v981_v46 = vpop.eup %980  ;;  %v749_v47 = vsel %vm733_vm11, %v682_v18, 0.0  ;;  %v683_v17 = vmul.f32 %v667_v7, %v1354_v42  ;;  %v653_v20 = vmul.f32 %v637_v52, %v637_v52  ;;  %v705_v58 = vadd.s32 120, %v1280_v45 }
 0x19a   : > { %v774_v48 = vsel %vm756_vm2, %v749_v47, 0.0  ;;  %v684_v21 = vmul.f32 %v668_v28, %v1363_v30  ;;  %v638_v3 = vsub.f32 1.0, %v981_v46  ;;  %v722_v6 = vadd.s32 %v1284_v26, %v704_v49 }
 0x19b   : > { %v775_v40 = vadd.f32 %v774_v48, %v773_v27  ;;  %v750_v2 = vsel %vm734_vm12, %v683_v17, 0.0  ;;  %v669_v16 = vmul.f32 0.25, %v653_v20  ;;  %vm737_vm15 = vcmp.lt.s32.totalorder %v721_v62, 300 }
 0x19c   : > { %v983_v36 = vpop.eup %982  ;;  %v776_v41 = vsel %vm756_vm2, %v750_v2, 0.0  ;;  %v751_v63 = vsel %vm735_vm13, %v684_v21, 0.0  ;;  %v654_v42 = vmul.f32 %v638_v3, %v638_v3  ;;  %vm738_vm1 = vcmp.lt.s32.totalorder %v722_v6, 300 }
 0x19d   : > { %v777_v25 = vadd.f32 %v776_v41, %v775_v40  ;;  %v778_v12 = vsel %vm756_vm2, %v751_v63, 0.0  ;;  %v685_v14 = vmul.f32 %v669_v16, %v1367_v5  ;;  %v639_v30 = vsub.f32 1.0, %v983_v36 }
 0x19e   : > { %v670_v19 = vmul.f32 0.25, %v654_v42  ;;  %v723_v5 = vadd.s32 %v1284_v26, %v705_v58 }
 0x19f   : > { %v779_v23 = vadd.f32 %v778_v12, %v777_v25  ;;  %v752_v43 = vsel %vm736_vm14, %v685_v14, 0.0  ;;  %v655_v24 = vmul.f32 %v639_v30, %v639_v30 }
 0x1a0   : > { %v985_v29 = vpop.eup %984  ;;  %v780_v4 = vsel %vm756_vm2, %v752_v43, 0.0  ;;  %v686_v53 = vmul.f32 %v670_v19, %v1380_v34  ;;  %vm739_vm0 = vcmp.lt.s32.totalorder %v723_v5, 300 }
 0x1a1   : > { %v781_v31 = vadd.f32 %v780_v4, %v779_v23  ;;  %v671_v32 = vmul.f32 0.25, %v655_v24  ;;  %v640_v15 = vsub.f32 1.0, %v985_v29 }
 0x1a2   : > { %v753_v59 = vsel %vm737_vm15, %v686_v53, 0.0 }
 0x1a3   : > { %v782_v33 = vsel %vm756_vm2, %v753_v59, 0.0  ;;  %v687_v45 = vmul.f32 %v671_v32, %v1388_v13  ;;  %v656_v10 = vmul.f32 %v640_v15, %v640_v15 }
 0x1a4   : > { %v783_v54 = vadd.f32 %v782_v33, %v781_v31 }
 0x1a5   : > { %v754_v57 = vsel %vm738_vm1, %v687_v45, 0.0  ;;  %v672_v37 = vmul.f32 0.25, %v656_v10 }
 0x1a6   : > { %v784_v60 = vsel %vm756_vm2, %v754_v57, 0.0 }
 0x1a7   : > { %v688_v34 = vmul.f32 %v672_v37, %v1400_v0  ;;  %v785_v38 = vadd.f32 %v784_v60, %v783_v54 }
 0x1a9   : > { %v755_v55 = vsel %vm739_vm0, %v688_v34, 0.0 }
 0x1aa   : > { %v786_v22 = vsel %vm756_vm2, %v755_v55, 0.0 }
 0x1ab   : > { %v787_v26 = vadd.f32 %v786_v22, %v785_v38 }
 0x1ad   : > { %788 = vadd.xlane.f32.xlu0 %v787_v26 }
 0x236   : > { %v789_v9 = vpop.xlane.xlu0 %788 }
 0x237   : > { %v790_v39 = vrot.slane %v789_v9, 4 }
 0x239   : > { %v791_v13 = vadd.f32 %v790_v39, %v789_v9 }
 0x23b   : > { %v792_v8 = vrot.slane %v791_v13, 2 }
 0x23d   : > { %v793_v50 = vadd.f32 %v792_v8, %v791_v13 }
 0x23f   : > { %v794_v44 = vrot.slane %v793_v50, 1 }
 0x241   : > { %v795_v61 = vadd.f32 %v794_v44, %v793_v50 }
 0x243   : > { %877 = vpush %v795_v61 }
 0x274   : > { %s878_s24 = spop %877 }
 0x275   : > { %v797_v0 = vstv %s878_s24 }
 0x276   : > { %798 = vst [vmem:[%s205_s23] sm:$0xff] %v797_v0 }
 0x277 PF: > { %s12_s9 = sadd.s32 1, %s992_s9  }
 0x278   : > { %p9_p5 = scmp.ge.s32.totalorder %s12_s9, 5  }
 0x27a   :  { %11 = sbr.rel (!%p9_p5) target bundleno = 1 (0x1), region = 61 }

</bundles_post_ra>
